<compile_context>
chip_gen: v7x
topology: tpu7x:2x2x1
jax: 0.10.0
libtpu: 0.0.40
codegen_flags: <defaults>
</compile_context>

<pallas_src>
import functools

import jax
import jax.numpy as jnp
from jax.experimental import pallas as pl
from jax.experimental.pallas import tpu as pltpu


def _round_up(x, m):
    return ((x + m - 1) // m) * m


def _mlp_kernel(x_ref, w1_ref, b1_ref, w2_ref, b2_ref, w3_ref, b3_ref, o_ref):
    # fc1 + relu   (dropout1 == identity in eval mode).
    # x arrives f32 straight from HBM; the bf16 cast is VPU work hidden under
    # the DMA/MXU, and halves nothing in HBM (we never re-write x).
    x_bf16 = x_ref[...].astype(jnp.bfloat16)
    h1 = jnp.dot(x_bf16, w1_ref[...], preferred_element_type=jnp.float32)
    h1 = jnp.maximum(h1 + b1_ref[...], 0.0)                       # f32 epilogue

    # fc2 + relu   (dropout2 == identity in eval mode)
    h2 = jnp.dot(h1.astype(w2_ref.dtype), w2_ref[...],
                 preferred_element_type=jnp.float32)
    h2 = jnp.maximum(h2 + b2_ref[...], 0.0)                       # f32 epilogue

    # fc3 (out_features == 1) + sigmoid.
    # Contract the hidden axis of w3 (1, H) against the hidden axis of h2
    # (TILE_B, H) so the logits come out as a lane-dense (1, TILE_B) row.
    logit = jax.lax.dot_general(
        w3_ref[...], h2.astype(w3_ref.dtype),
        dimension_numbers=(((1,), (1,)), ((), ())),
        preferred_element_type=jnp.float32,
    )                                                             # (1, TILE_B)
    logit = logit + b3_ref[0, 0]                                  # scalar from SMEM
    o_ref[...] = jax.nn.sigmoid(logit).astype(o_ref.dtype)


def prepare_params(w1, b1, w2, b2, w3, b3):
    """One-time weight prep: pad hidden dim to a lane multiple (60 -> 128,
    numerically exact since zero rows/cols contribute 0 and ReLU(0)=0) and cast
    matmul operands to bf16.  Call ONCE at init, not in the per-forward path."""
    in_features, hidden = w1.shape
    h_pad = _round_up(hidden, 128)   # keep 128: kernel is DMA-bound, not MXU-bound
    f32, bf16 = jnp.float32, jnp.bfloat16

    w1p = jnp.zeros((in_features, h_pad), bf16).at[:, :hidden].set(w1.astype(bf16))
    b1p = jnp.zeros((1, h_pad), f32).at[:, :hidden].set(b1.reshape(1, hidden).astype(f32))
    w2p = jnp.zeros((h_pad, h_pad), bf16).at[:hidden, :hidden].set(w2.astype(bf16))
    b2p = jnp.zeros((1, h_pad), f32).at[:, :hidden].set(b2.reshape(1, hidden).astype(f32))
    w3p = jnp.zeros((1, h_pad), bf16).at[:, :hidden].set(w3.reshape(1, hidden).astype(bf16))
    b3p = b3.reshape(1, 1).astype(f32)
    return w1p, b1p, w2p, b2p, w3p, b3p


@functools.partial(jax.jit, static_argnames=("tile_b",))
def neural_network_forward(x, w1p, b1p, w2p, b2p, w3p, b3p, *, tile_b=2048):
    """x: [B, input_size1] float32 (fed to the kernel un-padded, un-cast).
    w1p..b3p: outputs of prepare_params().  Returns sigmoid logits [B, 1]."""
    B, in_features = x.shape
    h_pad = w1p.shape[1]

    # Large tiles amortize the ~0.35 us per-step fixed cost.  Clamp to the
    # (8-aligned) batch, and for big batches split into >= 2 grid steps so the
    # "parallel" axis feeds both v7x TensorCores.
    tile = min(tile_b, _round_up(B, 8))
    if B >= 512:
        tile = min(tile, _round_up(pl.cdiv(B, 2), 128))
    num_tiles = pl.cdiv(B, tile)

    out = pl.pallas_call(
        _mlp_kernel,
        out_shape=jax.ShapeDtypeStruct((num_tiles, tile), jnp.float32),
        grid=(num_tiles,),
        in_specs=[
            pl.BlockSpec((tile, in_features), lambda i: (i, 0)),   # x tile (f32, streamed)
            pl.BlockSpec((in_features, h_pad), lambda i: (0, 0)),  # w1 (VMEM-resident)
            pl.BlockSpec((1, h_pad), lambda i: (0, 0)),            # b1 (resident)
            pl.BlockSpec((h_pad, h_pad), lambda i: (0, 0)),        # w2 (resident)
            pl.BlockSpec((1, h_pad), lambda i: (0, 0)),            # b2 (resident)
            pl.BlockSpec((1, h_pad), lambda i: (0, 0)),            # w3 row (resident)
            pl.BlockSpec(memory_space=pltpu.MemorySpace.SMEM),     # b3 scalar
        ],
        out_specs=pl.BlockSpec((1, tile), lambda i: (i, 0)),       # lane-dense row
        compiler_params=pltpu.CompilerParams(
            dimension_semantics=("parallel",),
            vmem_limit_bytes=32 * 1024 * 1024,
        ),
    )(x, w1p, b1p, w2p, b2p, w3p, b3p)

    # (num_tiles, tile) row-major == flat batch order -> strip padding -> (B, 1)
    return out.reshape(-1)[:B].reshape(B, 1)


def init_params(key, input_size1, hidden_size=60):
    """Deterministic synthetic parameters (PyTorch Linear init, stored transposed)."""
    k1, k2, k3, k4, k5, k6 = jax.random.split(key, 6)

    def uniform(k, shape, fan_in):
        bound = 1.0 / jnp.sqrt(fan_in)
        return jax.random.uniform(k, shape, jnp.float32, -bound, bound)

    w1 = uniform(k1, (input_size1, hidden_size), input_size1)   # fc1.weight.T
    b1 = uniform(k2, (1, hidden_size), input_size1)             # fc1.bias
    w2 = uniform(k3, (hidden_size, hidden_size), hidden_size)   # fc2.weight.T
    b2 = uniform(k4, (1, hidden_size), hidden_size)             # fc2.bias
    w3 = uniform(k5, (hidden_size, 1), hidden_size)             # fc3.weight.T
    b3 = uniform(k6, (1, 1), hidden_size)                       # fc3.bias
    return w1, b1, w2, b2, w3, b3


def reference_forward(x, w1, b1, w2, b2, w3, b3):
    h1 = jnp.maximum(x @ w1 + b1, 0.0)
    h2 = jnp.maximum(h1 @ w2 + b2, 0.0)
    return jax.nn.sigmoid(h2 @ w3 + b3)


if __name__ == "__main__":
    key = jax.random.PRNGKey(0)
    k_x, k_x2, k_p = jax.random.split(key, 3)

    input_size1 = 32
    hidden_size = 60
    raw_params = init_params(k_p, input_size1, hidden_size)
    params = prepare_params(*raw_params)          # one-time weight prep

    # Small test (single tile, tiny batch).
    batch = 8
    x = jax.random.normal(k_x, (batch, input_size1), jnp.float32)
    out = jax.block_until_ready(neural_network_forward(x, *params))
    ref = reference_forward(x, *raw_params)
    assert out.shape == (batch, 1), out.shape
    assert jnp.allclose(out, ref, atol=2e-2, rtol=0), float(jnp.max(jnp.abs(out - ref)))

    # Multi-tile test (exercises the batch grid axis + a partial boundary block).
    batch2 = 1000
    x2 = jax.random.normal(k_x2, (batch2, input_size1), jnp.float32)
    out2 = jax.block_until_ready(neural_network_forward(x2, *params))
    ref2 = reference_forward(x2, *raw_params)
    assert out2.shape == (batch2, 1), out2.shape
    assert jnp.allclose(out2, ref2, atol=2e-2, rtol=0), float(jnp.max(jnp.abs(out2 - ref2)))

    print("KERNEL_OK")
</pallas_src>

<mosaic_0001>
module attributes {stable_mosaic.version = 11 : i64} {
  func.func @_mlp_kernel(%arg0: i32, %arg1: memref<8x32xf32, #tpu.memory_space<vmem>>, %arg2: memref<32x128xbf16, #tpu.memory_space<vmem>>, %arg3: memref<1x128xf32, #tpu.memory_space<vmem>>, %arg4: memref<128x128xbf16, #tpu.memory_space<vmem>>, %arg5: memref<1x128xf32, #tpu.memory_space<vmem>>, %arg6: memref<1x128xbf16, #tpu.memory_space<vmem>>, %arg7: memref<1x1xf32, #tpu.memory_space<smem>>, %arg8: memref<1x8xf32, #tpu.memory_space<vmem>>) attributes {dimension_semantics = [#tpu.dimension_semantics<parallel>], iteration_bounds = array<i64: 1>, scalar_prefetch = 0 : i64, scratch_operands = 0 : i64, tpu.core_type = #tpu.core_type<tc>, window_params = [{transform_indices = @transform_0, window_bounds = array<i64: 8, 32>}, {pipeline_mode = #tpu.pipeline_mode<synchronous>, transform_indices = @transform_1, window_bounds = array<i64: 32, 128>}, {pipeline_mode = #tpu.pipeline_mode<synchronous>, transform_indices = @transform_2, window_bounds = array<i64: 1, 128>}, {pipeline_mode = #tpu.pipeline_mode<synchronous>, transform_indices = @transform_3, window_bounds = array<i64: 128, 128>}, {pipeline_mode = #tpu.pipeline_mode<synchronous>, transform_indices = @transform_4, window_bounds = array<i64: 1, 128>}, {pipeline_mode = #tpu.pipeline_mode<synchronous>, transform_indices = @transform_5, window_bounds = array<i64: 1, 128>}, {transform_indices = @transform_6, window_bounds = array<i64: 1, 1>}, {transform_indices = @transform_7, window_bounds = array<i64: 1, 8>}]} {
    %c0 = arith.constant 0 : index
    %c0_0 = arith.constant 0 : index
    %0 = vector.load %arg1[%c0, %c0_0] : memref<8x32xf32, #tpu.memory_space<vmem>>, vector<8x32xf32>
    %1 = arith.truncf %0 : vector<8x32xf32> to vector<8x32xbf16>
    %c0_1 = arith.constant 0 : index
    %c0_2 = arith.constant 0 : index
    %2 = vector.load %arg2[%c0_1, %c0_2] : memref<32x128xbf16, #tpu.memory_space<vmem>>, vector<32x128xbf16>
    %cst = arith.constant dense<0.000000e+00> : vector<8x128xf32>
    %3 = tpu.matmul %1, %2, %cst {dimension_numbers = #tpu.dot_dimension_numbers<[1], [0], [0], [1], [0, 0, 1, 1], [], []>} : vector<8x32xbf16>, vector<32x128xbf16>, vector<8x128xf32> -> vector<8x128xf32>
    %c0_3 = arith.constant 0 : index
    %c0_4 = arith.constant 0 : index
    %4 = vector.load %arg3[%c0_3, %c0_4] : memref<1x128xf32, #tpu.memory_space<vmem>>, vector<1x128xf32>
    %5 = vector.broadcast %4 : vector<1x128xf32> to vector<8x128xf32>
    %6 = arith.addf %3, %5 : vector<8x128xf32>
    %cst_5 = arith.constant 0.000000e+00 : f32
    %7 = vector.broadcast %cst_5 : f32 to vector<8x128xf32>
    %8 = arith.maximumf %6, %7 : vector<8x128xf32>
    %9 = arith.truncf %8 : vector<8x128xf32> to vector<8x128xbf16>
    %c0_6 = arith.constant 0 : index
    %c0_7 = arith.constant 0 : index
    %10 = vector.load %arg4[%c0_6, %c0_7] : memref<128x128xbf16, #tpu.memory_space<vmem>>, vector<128x128xbf16>
    %cst_8 = arith.constant dense<0.000000e+00> : vector<8x128xf32>
    %11 = tpu.matmul %9, %10, %cst_8 {dimension_numbers = #tpu.dot_dimension_numbers<[1], [0], [0], [1], [0, 0, 1, 1], [], []>} : vector<8x128xbf16>, vector<128x128xbf16>, vector<8x128xf32> -> vector<8x128xf32>
    %c0_9 = arith.constant 0 : index
    %c0_10 = arith.constant 0 : index
    %12 = vector.load %arg5[%c0_9, %c0_10] : memref<1x128xf32, #tpu.memory_space<vmem>>, vector<1x128xf32>
    %13 = vector.broadcast %12 : vector<1x128xf32> to vector<8x128xf32>
    %14 = arith.addf %11, %13 : vector<8x128xf32>
    %cst_11 = arith.constant 0.000000e+00 : f32
    %15 = vector.broadcast %cst_11 : f32 to vector<8x128xf32>
    %16 = arith.maximumf %14, %15 : vector<8x128xf32>
    %c0_12 = arith.constant 0 : index
    %c0_13 = arith.constant 0 : index
    %17 = vector.load %arg6[%c0_12, %c0_13] : memref<1x128xbf16, #tpu.memory_space<vmem>>, vector<1x128xbf16>
    %18 = arith.truncf %16 : vector<8x128xf32> to vector<8x128xbf16>
    %cst_14 = arith.constant dense<0.000000e+00> : vector<1x8xf32>
    %19 = tpu.matmul %17, %18, %cst_14 {dimension_numbers = #tpu.dot_dimension_numbers<[1], [1], [0], [0], [0, 0, 1, 0], [], []>} : vector<1x128xbf16>, vector<8x128xbf16>, vector<1x8xf32> -> vector<1x8xf32>
    %c0_15 = arith.constant 0 : index
    %c0_16 = arith.constant 0 : index
    %20 = memref.load %arg7[%c0_15, %c0_16] : memref<1x1xf32, #tpu.memory_space<smem>>
    %21 = vector.broadcast %20 : f32 to vector<1x8xf32>
    %22 = arith.addf %19, %21 : vector<1x8xf32>
    %23 = arith.negf %22 : vector<1x8xf32>
    %24 = math.exp %23 : vector<1x8xf32>
    %cst_17 = arith.constant 1.000000e+00 : f32
    %25 = vector.broadcast %cst_17 : f32 to vector<1x8xf32>
    %26 = arith.addf %25, %24 : vector<1x8xf32>
    %27 = arith.divf %25, %26 : vector<1x8xf32>
    %c0_18 = arith.constant 0 : index
    %c0_19 = arith.constant 0 : index
    %28 = vector.load %arg8[%c0_18, %c0_19] : memref<1x8xf32, #tpu.memory_space<vmem>>, vector<1x8xf32>
    tpu.vector_store %arg8[%c0_18, %c0_19], %27 {strides = array<i32>} : memref<1x8xf32, #tpu.memory_space<vmem>>, vector<1x8xf32>,
    return
  }
  func.func @transform_0(%arg0: i32) -> (i32, i32) {
    %c0_i32 = arith.constant 0 : i32
    %c0_i32_0 = arith.constant 0 : i32
    return %arg0, %c0_i32 : i32, i32
  }
  func.func @transform_1(%arg0: i32) -> (i32, i32) {
    %c0_i32 = arith.constant 0 : i32
    %c0_i32_0 = arith.constant 0 : i32
    %c0_i32_1 = arith.constant 0 : i32
    return %c0_i32, %c0_i32_0 : i32, i32
  }
  func.func @transform_2(%arg0: i32) -> (i32, i32) {
    %c0_i32 = arith.constant 0 : i32
    %c0_i32_0 = arith.constant 0 : i32
    %c0_i32_1 = arith.constant 0 : i32
    return %c0_i32, %c0_i32_0 : i32, i32
  }
  func.func @transform_3(%arg0: i32) -> (i32, i32) {
    %c0_i32 = arith.constant 0 : i32
    %c0_i32_0 = arith.constant 0 : i32
    %c0_i32_1 = arith.constant 0 : i32
    return %c0_i32, %c0_i32_0 : i32, i32
  }
  func.func @transform_4(%arg0: i32) -> (i32, i32) {
    %c0_i32 = arith.constant 0 : i32
    %c0_i32_0 = arith.constant 0 : i32
    %c0_i32_1 = arith.constant 0 : i32
    return %c0_i32, %c0_i32_0 : i32, i32
  }
  func.func @transform_5(%arg0: i32) -> (i32, i32) {
    %c0_i32 = arith.constant 0 : i32
    %c0_i32_0 = arith.constant 0 : i32
    %c0_i32_1 = arith.constant 0 : i32
    return %c0_i32, %c0_i32_0 : i32, i32
  }
  func.func @transform_6(%arg0: i32) -> (i32, i32) {
    %c0_i32 = arith.constant 0 : i32
    %c0_i32_0 = arith.constant 0 : i32
    %c0_i32_1 = arith.constant 0 : i32
    return %c0_i32, %c0_i32_0 : i32, i32
  }
  func.func @transform_7(%arg0: i32) -> (i32, i32) {
    %c0_i32 = arith.constant 0 : i32
    %c0_i32_0 = arith.constant 0 : i32
    return %arg0, %c0_i32 : i32, i32
  }
}

</mosaic_0001>

<bundles_post_ra>
// kernel: neural_network_forward.1
= control target key start
LH: loop header
LB: loop body
LE: loop exit
PB: predicated region body
PF: predicated region fallthrough
CT: control target
= control target key end

     0   :  { %13 = vsyncpa [#allocation4], 0  ;;  %s614_s0 = inlined_call_operand.hbm [shape: f32[8,32], index: 0, kind: input, shape index: {}]   ;;  %s615_s1 = inlined_call_operand.hbm [shape: bf16[32,128], index: 1, kind: input, shape index: {}]   ;;  %s616_s2 = inlined_call_operand.vmem [shape: f32[1,128], index: 2, kind: input, shape index: {}]   ;;  %s617_s3 = inlined_call_operand.hbm [shape: bf16[128,128], index: 3, kind: input, shape index: {}]   ;;  %s618_s4 = inlined_call_operand.vmem [shape: f32[1,128], index: 4, kind: input, shape index: {}]   ;;  %s619_s5 = inlined_call_operand.vmem [shape: bf16[1,128], index: 5, kind: input, shape index: {}]   ;;  %s620_s6 = inlined_call_operand.<no memory space> [shape: f32[1,1], index: 6, kind: input, shape index: {}]   ;;  %s621_s7 = inlined_call_operand.hbm [shape: f32[1,8], index: 7, kind: output, shape index: {}]  }
   0x1   :  { %14 = vsyncpa [#allocation7], 0 }
   0x2   :  { %15 = vsyncpa [#allocation5], 0  ;;  %s497_s24 = smov [#allocation6]   ;;  %s403_s28 = scalar_lea.hbm %s615_s1, 256 }
   0x3   :  { %s31_s25 = sshll.u32 %s497_s24, 4  ;;  %p404_p0 = scmp.ne.s32.totalorder %s615_s1, %s403_s28  ;;  %s32_s25 = int_to_ptr.vmem [resolvable:$true] %s31_s25 }
   0x4   :  { %p407_p1 = scmp.lt.u32.totalorder %s403_s28, %s615_s1 }
   0x6   :  { %p409_p2 = pnand %p407_p1, %p404_p0 }
   0x8   :  { %412 = shalt.err (!%p409_p2)
}
   0x9   :  { %s413_s10 = scalar_lea.vmem %s32_s25, 256  ;;  %p418_p4 = scmp.lt.s32.totalorder %s32_s25, %s32_s25 }
   0xa   :  { %p414_p3 = scmp.ne.s32.totalorder %s32_s25, %s413_s10  ;;  %p419_p5 = scmp.lt.s32.totalorder %s413_s10, %s413_s10 }
   0xc   :  { %p420_p6 = por %p419_p5, %p418_p4 }
   0xe   :  { %p421_p7 = pnand %p420_p6, %p414_p3 }
  0x10   :  { %424 = shalt.err (!%p421_p7)
}
  0x11   :  { %s498_s11 = smov 64   ;;  %s499_s12 = smov 4  }
  0x12   :  { %37 = dma.hbm_to_vmem [thread:$0]  %s615_s1, 256, %s32_s25, [#allocation7], %s498_s11, %s498_s11, %s499_s12  }
  0x13   :  { %s500_s15 = smov [#allocation3]   ;;  %s501_s17 = smov [#allocation8]  }
  0x14   :  { %s22_s16 = sshll.u32 %s500_s15, 4  ;;  %s45_s18 = sshll.u32 %s501_s17, 4  ;;  %s23_s16 = int_to_ptr.vmem [resolvable:$true] %s22_s16  ;;  %s46_s18 = int_to_ptr.vmem [resolvable:$true] %s45_s18 }
  0x15   :  { %s425_s21 = scalar_lea.hbm %s614_s0, 128 }
  0x16   :  { %p426_p8 = scmp.ne.s32.totalorder %s614_s0, %s425_s21  ;;  %p429_p9 = scmp.lt.u32.totalorder %s425_s21, %s614_s0 }
  0x18   :  { %p431_p10 = pnand %p429_p9, %p426_p8 }
  0x1a   :  { %434 = shalt.err (!%p431_p10)
}
  0x1b   :  { %s435_s1 = scalar_lea.vmem %s23_s16, 128  ;;  %p440_p12 = scmp.lt.s32.totalorder %s23_s16, %s23_s16 }
  0x1c   :  { %p436_p11 = scmp.ne.s32.totalorder %s23_s16, %s435_s1  ;;  %p441_p13 = scmp.lt.s32.totalorder %s435_s1, %s435_s1 }
  0x1e   :  { %p442_p0 = por %p441_p13, %p440_p12 }
  0x20   :  { %p443_p1 = pnand %p442_p0, %p436_p11 }
  0x22   :  { %446 = shalt.err (!%p443_p1)
}
  0x23   :  { %25 = dma.hbm_to_vmem [thread:$0]  %s614_s0, 128, %s23_s16, [#allocation4]  }
  0x24   :  { %s447_s30 = scalar_lea.hbm %s617_s3, 1024 }
  0x25   :  { %p448_p2 = scmp.ne.s32.totalorder %s617_s3, %s447_s30  ;;  %p451_p3 = scmp.lt.u32.totalorder %s447_s30, %s617_s3 }
  0x27   :  { %p453_p4 = pnand %p451_p3, %p448_p2 }
  0x29   :  { %456 = shalt.err (!%p453_p4)
}
  0x2a   :  { %s457_s14 = scalar_lea.vmem %s46_s18, 1024  ;;  %p462_p6 = scmp.lt.s32.totalorder %s46_s18, %s46_s18 }
  0x2b   :  { %p458_p5 = scmp.ne.s32.totalorder %s46_s18, %s457_s14  ;;  %p463_p7 = scmp.lt.s32.totalorder %s457_s14, %s457_s14 }
  0x2d   :  { %p464_p8 = por %p463_p7, %p462_p6 }
  0x2f   :  { %p465_p9 = pnand %p464_p8, %p458_p5 }
  0x31   :  { %468 = shalt.err (!%p465_p9)
}
  0x32   :  { %51 = dma.hbm_to_vmem [thread:$0]  %s617_s3, 1024, %s46_s18, [#allocation7], %s498_s11, %s498_s11, %s499_s12  }
  0x33   :  { %491 = dma.done.wait [#allocation4], 128  }
  0x34   :  { %492 = vsyncadd [#allocation4], 4294967168 }
  0x35   :  { %493 = dma.done.wait [#allocation7], 1280  }
  0x36   :  { %494 = vsyncadd [#allocation7], 4294966016  ;;  %v502_v0 = vmov 0.0   ;;  %vm503_vm0 = vmmov 0   ;;  %v389_v1 = vld [vmem:[#allocation6] sm:$0xff]   ;;  %v390_v2 = vld [vmem:[#allocation6 + $0x8] sm:$0xff]   ;;  %v254_v30 = vstv %s620_s6 }
  0x37   :  { %347 = vmatprep.subr.bf16.mxu0 %v502_v0  ;;  %351 = vmatprep.mubr.msk.bf16.mxu0 %vm503_vm0, %v502_v0  ;;  %v68_v3 = vld [vmem:[#allocation3] sm:$0xff]  ;;  %v391_v4 = vld [vmem:[#allocation8] sm:$0xff]   ;;  %vm93_vm1 = vcmask 261120   ;;  %v393_v7 = vld [vmem:[#allocation8 + $0x10] sm:$0xff]   ;;  %vm301_vm2 = vcmask 57344  }
  0x38   :  { %355 = vmatprep.subr.bf16.mxu1 %v502_v0  ;;  %371 = vmatprep.mubr.msk.bf16.mxu1 %vm503_vm0, %v502_v0  ;;  %v69_v5 = vpack.c.bf16 %v68_v3, %v68_v3  ;;  %v392_v6 = vld [vmem:[#allocation8 + $0x8] sm:$0xff]   ;;  %v394_v8 = vld [vmem:[#allocation8 + $0x18] sm:$0xff]   ;;  %v395_v9 = vld [vmem:[#allocation8 + $0x20] sm:$0xff]  }
  0x39   :  { %348 = vmatpush3.bf16.msra.mxu0 %v389_v1  ;;  %356 = vmatpush3.bf16.msra.mxu1 %v391_v4  ;;  %v396_v10 = vld [vmem:[#allocation8 + $0x28] sm:$0xff]   ;;  %v397_v11 = vld [vmem:[#allocation8 + $0x30] sm:$0xff]   ;;  %v398_v12 = vld [vmem:[#allocation8 + $0x38] sm:$0xff]  }
  0x3a   :  { %349 = vmatprep.subr.bf16.mxu0 %v502_v0  ;;  %357 = vmatprep.subr.bf16.mxu1 %v502_v0  ;;  %v319_v13 = vld [vmem:[%s616_s2] ss:$0 sm:$0xff] }
  0x3b   :  { %v323_v21 = vld [vmem:[%s618_s4] ss:$0 sm:$0xff]  ;;  %s504_s4 = smov [#allocation9]  }
  0x3c   :  { %v251_v29 = vld [vmem:[%s619_s5] sm:$0x1]  ;;  %s309_s20 = sshll.u32 %s504_s4, 4  ;;  %s310_s20 = int_to_ptr.vmem [resolvable:$true] %s309_s20 }
  0x3d   :  { %350 = vmatpush3.bf16.msra.mxu0 %v390_v2  ;;  %358 = vmatpush3.bf16.msra.mxu1 %v392_v6  ;;  %s469_s5 = scalar_lea.vmem %s310_s20, 16  ;;  %s473_s21 = scalar_lea.vmem %s310_s20, 32 }
  0x3e   :  { %375 = vmatprep.subr.bf16.mxu0 %v502_v0  ;;  %359 = vmatprep.subr.bf16.mxu1 %v502_v0  ;;  %p470_p10 = scmp.ne.s32.totalorder %s310_s20, %s469_s5  ;;  %p474_p11 = scmp.lt.s32.totalorder %s310_s20, %s310_s20 }
  0x3f   :  { %p475_p12 = scmp.lt.s32.totalorder %s473_s21, %s469_s5 }
  0x40   :  { %352 = vmatmul.mubr.msk.bf16.vlgmr.msra.gmra.mrb[0].mxu0 %vm93_vm1, %v69_v5 }
  0x41   :  { %377 = vmatprep.mubr.msk.bf16.mxu0 %vm503_vm0, %v502_v0  ;;  %360 = vmatpush3.bf16.msra.mxu1 %v393_v7  ;;  %p476_p13 = por %p475_p12, %p474_p11 }
  0x42   :  { %361 = vmatprep.subr.bf16.mxu1 %v502_v0 }
  0x43   :  { %p477_p0 = pnand %p476_p13, %p470_p10 }
  0x45   :  { %362 = vmatpush3.bf16.msra.mxu1 %v394_v8 }
  0x46   :  { %363 = vmatprep.subr.bf16.mxu1 %v502_v0 }
  0x49   :  { %364 = vmatpush3.bf16.msra.mxu1 %v395_v9 }
  0x4a   :  { %365 = vmatprep.subr.bf16.mxu1 %v502_v0 }
  0x4d   :  { %366 = vmatpush3.bf16.msra.mxu1 %v396_v10 }
  0x4e   :  { %367 = vmatprep.subr.bf16.mxu1 %v502_v0 }
  0x51   :  { %368 = vmatpush3.bf16.msra.mxu1 %v397_v11 }
  0x52   :  { %369 = vmatprep.subr.bf16.mxu1 %v502_v0 }
  0x55   :  { %370 = vmatpush3.bf16.msra.mxu1 %v398_v12 }
 0x113   :  { %v131_v14 = vpop.f32.mrb[0].mxu0 }
 0x114   :  { %v132_v15 = vadd.f32 %v319_v13, %v131_v14  ;;  %v353_v16 = vpop.f32.mrb[1].mxu0 }
 0x115   :  { %v134_v17 = vpop.f32.mrb[2].mxu0 }
 0x116   :  { %v137_v18 = vmax.f32 %v132_v15, 0.0  ;;  %v354_v19 = vpop.f32.mrb[3].mxu0 }
 0x118   :  { %v138_v20 = vpack.c.bf16 %v137_v18, %v137_v18 }
 0x11a   :  { %372 = vmatmul.mubr.bf16.vlgmr.msra.gmra.mrb[0].mxu1 %v138_v20 }
 0x1ed   :  { %v244_v22 = vpop.f32.mrb[0].mxu1 }
 0x1ee   :  { %v245_v23 = vadd.f32 %v323_v21, %v244_v22  ;;  %v373_v24 = vpop.f32.mrb[1].mxu1 }
 0x1ef   :  { %v247_v25 = vpop.f32.mrb[2].mxu1 }
 0x1f0   :  { %v250_v26 = vmax.f32 %v245_v23, 0.0  ;;  %v374_v27 = vpop.f32.mrb[3].mxu1 }
 0x1f2   :  { %v252_v28 = vpack.c.bf16 %v250_v26, %v250_v26 }
 0x1f4   :  { %376 = vmatpush3.bf16.xpose.msra.mxu0 %v252_v28 }
 0x1fb   :  { %378 = vmatmul.mubr.bf16.vlgmr.msra.gmra.mrb[4].mxu0 %v251_v29 }
 0x2ce   :  { %v289_v31 = vpop.f32.mrb[4].mxu0 }
 0x2cf   :  { %v290_v32 = vadd.f32 %v289_v31, %v254_v30  ;;  %v379_v33 = vpop.f32.mrb[5].mxu0 }
 0x2d0   :  { %v292_v34 = vpop.f32.mrb[6].mxu0 }
 0x2d1   :  { %v332_v35 = vmul.f32 -1.442695, %v290_v32  ;;  %v380_v36 = vpop.f32.mrb[7].mxu0 }
 0x2d3   :  { %399 = vpow2.f32 %v332_v35 }
 0x2dd   :  { %v400_v37 = vpop.eup %399 }
 0x2de   :  { %v298_v38 = vadd.f32 1.0, %v400_v37 }
 0x2e0   :  { %401 = vrcp.f32 %v298_v38 }
 0x2ea   :  { %v402_v39 = vpop.eup %401 }
 0x2eb   :  { %302 = vst.msk [vmem:[#allocation9] sm:$0x1] %vm301_vm2, %v402_v39 }
 0x2ec   :  { %480 = shalt.err (!%p477_p0)
}
 0x2ed   :  { %s481_s23 = scalar_lea.hbm %s621_s7, 16 }
 0x2ee   :  { %p482_p1 = scmp.ne.s32.totalorder %s621_s7, %s481_s23  ;;  %p485_p2 = scmp.lt.u32.totalorder %s481_s23, %s621_s7 }
 0x2f0   :  { %p487_p3 = pnand %p485_p2, %p482_p1 }
 0x2f2   :  { %490 = shalt.err (!%p487_p3)
}
 0x2f3   :  { %312 = dma.vmem_to_hbm [thread:$0]  %s310_s20, 16, %s621_s7, [#allocation5]  }
 0x2f4   :  { %495 = dma.done.wait [#allocation5], 16  }
 0x2f5   :  { %496 = vsyncadd [#allocation5], 4294967280 }
 0x2f6   :  { %316 = vsyncpa [#allocation4], 1 }
 0x2f7   :  { %317 = vsyncpa [#allocation7], 1 }
 0x2f8   :  { %318 = vsyncpa [#allocation5], 1 }

</bundles_post_ra>
